<compile_context>
chip_gen: v7x
topology: tpu7x:2x2x1
jax: 0.10.0
libtpu: 0.0.40
codegen_flags: <defaults>
</compile_context>

<pallas_src>
import functools

import jax
import jax.numpy as jnp
from jax.experimental import pallas as pl
from jax.experimental.pallas import tpu as pltpu


def _round_up(n, m):
    return ((n + m - 1) // m) * m


def _cdiv(a, b):
    return -(-a // b)


def _vmem_budget_bytes():
    """Usable per-core VMEM budget (leave headroom below physical capacity)."""
    try:
        cap = int(pltpu.get_tpu_info().vmem_capacity_bytes)
    except Exception:  # query unavailable -> conservative (v7x per-TC size)
        cap = 64 << 20
    return int(cap * 0.85)


# --------------------------------------------------------------------------
# Kernels
# --------------------------------------------------------------------------
def _mlp_kernel_resident(x_ref, w1_ref, b1_ref, w2_ref, b2_ref, o_ref):
    """Weights fully resident in VMEM; grid = (row tiles,)."""
    # x_ref: (TM, Dp)  w1_ref: (Dp, Hp)  b1_ref: (1, Hp)
    # w2_ref: (Hp, Dp) b2_ref: (1, Dp)   o_ref:  (TM, Dp)
    h = jnp.dot(x_ref[...], w1_ref[...], preferred_element_type=jnp.float32)
    h = jnp.maximum(h + b1_ref[...], 0.0)
    y = jnp.dot(h.astype(w2_ref.dtype), w2_ref[...],
                preferred_element_type=jnp.float32)
    # Dropout with p = 0.0 is an identity.
    o_ref[...] = (y + b2_ref[...]).astype(o_ref.dtype)


def _mlp_kernel_stream_f32out(x_ref, w1_ref, b1_ref, w2_ref, b2_ref, o_ref):
    """Hidden axis streamed; f32 output block doubles as the accumulator."""
    k = pl.program_id(1)

    @pl.when(k == 0)
    def _():
        o_ref[...] = jnp.zeros_like(o_ref)

    h = jnp.dot(x_ref[...], w1_ref[...], preferred_element_type=jnp.float32)
    h = jnp.maximum(h + b1_ref[...], 0.0)
    o_ref[...] += jnp.dot(h.astype(w2_ref.dtype), w2_ref[...],
                          preferred_element_type=jnp.float32)

    @pl.when(k == pl.num_programs(1) - 1)
    def _():
        o_ref[...] += b2_ref[...]


def _mlp_kernel_stream_acc(x_ref, w1_ref, b1_ref, w2_ref, b2_ref, o_ref,
                           acc_ref):
    """Hidden axis streamed; non-f32 output needs a separate f32 accumulator."""
    k = pl.program_id(1)

    @pl.when(k == 0)
    def _():
        acc_ref[...] = jnp.zeros_like(acc_ref)

    h = jnp.dot(x_ref[...], w1_ref[...], preferred_element_type=jnp.float32)
    h = jnp.maximum(h + b1_ref[...], 0.0)
    acc_ref[...] += jnp.dot(h.astype(w2_ref.dtype), w2_ref[...],
                            preferred_element_type=jnp.float32)

    @pl.when(k == pl.num_programs(1) - 1)
    def _():
        o_ref[...] = (acc_ref[...] + b2_ref[...]).astype(o_ref.dtype)


# --------------------------------------------------------------------------
# Parameter relayout (done once, outside the per-forward path)
# --------------------------------------------------------------------------
def prepare_params(w1, b1, w2, b2, compute_dtype=jnp.bfloat16):
    """One-time relayout: transpose to [in, out], pad lanes to 128, cast to
    the MXU compute dtype.  Zero padding is numerically exact."""
    H, D = w1.shape                      # nn.Linear weight: [out, in]
    assert w2.shape == (D, H)
    D_pad = _round_up(D, 128)
    H_pad = _round_up(H, 128)

    def pad2(a, r, c):
        if a.shape == (r, c):
            return a
        return jnp.pad(a, ((0, r - a.shape[0]), (0, c - a.shape[1])))

    w1p = pad2(w1.T.astype(compute_dtype), D_pad, H_pad)      # (Dp, Hp)
    w2p = pad2(w2.T.astype(compute_dtype), H_pad, D_pad)      # (Hp, Dp)
    b1p = pad2(b1.astype(jnp.float32).reshape(1, H), 1, H_pad)  # f32, exact add
    b2p = pad2(b2.astype(jnp.float32).reshape(1, D), 1, D_pad)
    return {"w1": w1p, "b1": b1p, "w2": w2p, "b2": b2p}


# --------------------------------------------------------------------------
# Forward
# --------------------------------------------------------------------------
@functools.partial(jax.jit,
                   static_argnames=("tile_m_max", "tile_h_max", "force_stream"))
def mlp_forward(x, w1p, b1p, w2p, b2p, tile_m_max=1024, tile_h_max=2048,
                force_stream=False):
    """x: [..., D]; w1p: [Dp, Hp]; b1p: [1, Hp]; w2p: [Hp, Dp]; b2p: [1, Dp]."""
    orig_shape = x.shape
    D = x.shape[-1]
    M = x.size // D
    D_pad, H_pad = w1p.shape
    assert w2p.shape == (H_pad, D_pad)

    cdtype = w1p.dtype                   # MXU compute dtype (bf16)
    out_dtype = x.dtype
    cbytes = jnp.dtype(cdtype).itemsize
    obytes = jnp.dtype(out_dtype).itemsize
    budget = _vmem_budget_bytes()
    headroom = 4 << 20

    # ---- row tiling ("parallel" axis): divisor-friendly, >=2 blocks ----
    M_al = _round_up(M, 32)
    num_m = max(1, _cdiv(M_al, tile_m_max))
    if num_m == 1 and M_al >= 64:
        num_m = 2                        # keep both v7x TensorCores busy
    tile_m = _round_up(_cdiv(M_al, num_m), 32)
    M_pad = num_m * tile_m

    x2d = x.reshape(M, D).astype(cdtype)
    if (M_pad, D_pad) != (M, D):
        x2d = jnp.pad(x2d, ((0, M_pad - M), (0, D_pad - D)))

    def tiles_bytes(tm):                 # double-buffered x + out tiles
        return 2 * tm * D_pad * (cbytes + obytes)

    bias_bytes = 2 * 8 * (H_pad + D_pad) * 4
    w_resident_bytes = 2 * (D_pad * H_pad + H_pad * D_pad) * cbytes + bias_bytes
    use_resident = (not force_stream) and (
        w_resident_bytes + tiles_bytes(tile_m) + headroom <= budget)

    if use_resident:
        grid = (num_m,)
        in_specs = [
            pl.BlockSpec((tile_m, D_pad), lambda i: (i, 0)),      # x rows
            pl.BlockSpec((D_pad, H_pad), lambda i: (0, 0)),       # W1 resident
            pl.BlockSpec((1, H_pad), lambda i: (0, 0)),           # b1
            pl.BlockSpec((H_pad, D_pad), lambda i: (0, 0)),       # W2 resident
            pl.BlockSpec((1, D_pad), lambda i: (0, 0)),           # b2
        ]
        out_spec = pl.BlockSpec((tile_m, D_pad), lambda i: (i, 0))
        kernel = _mlp_kernel_resident
        scratch = []
        dims = ("parallel",)
        vmem_need = w_resident_bytes + tiles_bytes(tile_m)
        weight_reads = 1
    else:
        # ---- hidden-axis streaming: tile_h must divide H_pad (mult of 128) ----
        tile_h = min(_round_up(tile_h_max, 128), H_pad)

        def stream_bytes(th):
            wb = 2 * (D_pad * th + th * D_pad) * cbytes + 2 * 8 * (th + D_pad) * 4
            acc = 0 if out_dtype == jnp.float32 else tile_m * D_pad * 4
            return wb + tiles_bytes(tile_m) + acc

        while tile_h > 128 and (H_pad % tile_h != 0
                                or stream_bytes(tile_h) + headroom > budget):
            tile_h -= 128

        grid = (num_m, H_pad // tile_h)
        in_specs = [
            pl.BlockSpec((tile_m, D_pad), lambda i, k: (i, 0)),   # x rows
            pl.BlockSpec((D_pad, tile_h), lambda i, k: (0, k)),   # W1 chunk
            pl.BlockSpec((1, tile_h), lambda i, k: (0, k)),       # b1 chunk
            pl.BlockSpec((tile_h, D_pad), lambda i, k: (k, 0)),   # W2 chunk
            pl.BlockSpec((1, D_pad), lambda i, k: (0, 0)),        # b2
        ]
        out_spec = pl.BlockSpec((tile_m, D_pad), lambda i, k: (i, 0))
        dims = ("parallel", "arbitrary")
        if out_dtype == jnp.float32:
            kernel = _mlp_kernel_stream_f32out   # accumulate directly in o_ref
            scratch = []
        else:
            kernel = _mlp_kernel_stream_acc
            scratch = [pltpu.VMEM((tile_m, D_pad), jnp.float32)]
        vmem_need = stream_bytes(tile_h)
        weight_reads = num_m

    vmem_limit = max(32 << 20, min(vmem_need + headroom, budget))

    cost = pl.CostEstimate(
        flops=4 * M_pad * D_pad * H_pad,          # two matmuls: 2*M*D*H each
        transcendentals=0,
        bytes_accessed=(M_pad * D_pad * (cbytes + obytes)
                        + weight_reads * 2 * D_pad * H_pad * cbytes
                        + (H_pad + D_pad) * 4),
    )

    out2d = pl.pallas_call(
        kernel,
        out_shape=jax.ShapeDtypeStruct((M_pad, D_pad), out_dtype),
        grid_spec=pltpu.PrefetchScalarGridSpec(
            num_scalar_prefetch=0,
            grid=grid,
            in_specs=in_specs,
            out_specs=out_spec,
            scratch_shapes=scratch,
        ),
        compiler_params=pltpu.CompilerParams(
            dimension_semantics=dims,
            vmem_limit_bytes=int(vmem_limit)),
        cost_estimate=cost,
    )(x2d, w1p, b1p, w2p, b2p)

    return out2d[:M, :D].reshape(orig_shape)


# --------------------------------------------------------------------------
# Test harness
# --------------------------------------------------------------------------
def init_params(key, n_embd):
    """Deterministic parameter init (same shapes/convention as nn.Linear)."""
    h = 4 * n_embd
    k1, k2, k3, k4 = jax.random.split(key, 4)
    bound1 = 1.0 / jnp.sqrt(n_embd)
    w1 = jax.random.uniform(k1, (h, n_embd), jnp.float32, -bound1, bound1)
    b1 = jax.random.uniform(k2, (h,), jnp.float32, -bound1, bound1)
    bound2 = 1.0 / jnp.sqrt(h)
    w2 = jax.random.uniform(k3, (n_embd, h), jnp.float32, -bound2, bound2)
    b2 = jax.random.uniform(k4, (n_embd,), jnp.float32, -bound2, bound2)
    return w1, b1, w2, b2


def _run_case(B, T, n_embd, key, x_dtype=jnp.float32, **fwd_kwargs):
    kx, kp = jax.random.split(key)
    x = jax.random.normal(kx, (B, T, n_embd), dtype=jnp.float32).astype(x_dtype)
    w1, b1, w2, b2 = init_params(kp, n_embd)

    # One-time relayout (transpose / pad / bf16-cast) hoisted out of forward.
    p = prepare_params(w1, b1, w2, b2)
    y = mlp_forward(x, p["w1"], p["b1"], p["w2"], p["b2"], **fwd_kwargs)
    y = jax.block_until_ready(y)

    # Reference in plain f32 JAX (matches PyTorch semantics with dropout p=0).
    xf = x.astype(jnp.float32)
    h_ref = jnp.maximum(xf @ w1.T + b1, 0.0)
    y_ref = h_ref @ w2.T + b2
    assert y.shape == (B, T, n_embd)
    yf = y.astype(jnp.float32)
    err = float(jnp.max(jnp.abs(yf - y_ref)))
    assert jnp.allclose(yf, y_ref, atol=3e-2, rtol=3e-2), err


if __name__ == "__main__":
    key = jax.random.PRNGKey(0)
    k1, k2, k3, k4 = jax.random.split(key, 4)

    # Tiny case (matches the module's toy config): batch=2, seq=8, n_embd=32.
    _run_case(2, 8, 32, k1)
    # Larger case: resident-weights path, 2 row blocks on the parallel axis.
    _run_case(2, 160, 256, k2)
    # Force the hidden-streaming path (f32 output accumulates into o_ref).
    _run_case(2, 160, 256, k3, force_stream=True, tile_h_max=512)
    # Streaming path with bf16 output (separate f32 accumulator scratch).
    _run_case(2, 64, 128, k4, x_dtype=jnp.bfloat16, force_stream=True,
              tile_h_max=256)

    print("KERNEL_OK")
</pallas_src>

<mosaic_0001>
module attributes {stable_mosaic.version = 11 : i64} {
  func.func @_mlp_kernel_resident(%arg0: i32, %arg1: memref<32x128xbf16, #tpu.memory_space<vmem>>, %arg2: memref<128x128xbf16, #tpu.memory_space<vmem>>, %arg3: memref<1x128xf32, #tpu.memory_space<vmem>>, %arg4: memref<128x128xbf16, #tpu.memory_space<vmem>>, %arg5: memref<1x128xf32, #tpu.memory_space<vmem>>, %arg6: memref<32x128xf32, #tpu.memory_space<vmem>>) attributes {dimension_semantics = [#tpu.dimension_semantics<parallel>], iteration_bounds = array<i64: 1>, scalar_prefetch = 0 : i64, scratch_operands = 0 : i64, tpu.core_type = #tpu.core_type<tc>, window_params = [{transform_indices = @transform_0, window_bounds = array<i64: 32, 128>}, {pipeline_mode = #tpu.pipeline_mode<synchronous>, transform_indices = @transform_1, window_bounds = array<i64: 128, 128>}, {pipeline_mode = #tpu.pipeline_mode<synchronous>, transform_indices = @transform_2, window_bounds = array<i64: 1, 128>}, {pipeline_mode = #tpu.pipeline_mode<synchronous>, transform_indices = @transform_3, window_bounds = array<i64: 128, 128>}, {pipeline_mode = #tpu.pipeline_mode<synchronous>, transform_indices = @transform_4, window_bounds = array<i64: 1, 128>}, {transform_indices = @transform_5, window_bounds = array<i64: 32, 128>}]} {
    %c0 = arith.constant 0 : index
    %c0_0 = arith.constant 0 : index
    %0 = vector.load %arg1[%c0, %c0_0] : memref<32x128xbf16, #tpu.memory_space<vmem>>, vector<32x128xbf16>
    %c0_1 = arith.constant 0 : index
    %c0_2 = arith.constant 0 : index
    %1 = vector.load %arg2[%c0_1, %c0_2] : memref<128x128xbf16, #tpu.memory_space<vmem>>, vector<128x128xbf16>
    %cst = arith.constant dense<0.000000e+00> : vector<32x128xf32>
    %2 = tpu.matmul %0, %1, %cst {dimension_numbers = #tpu.dot_dimension_numbers<[1], [0], [0], [1], [0, 0, 1, 1], [], []>} : vector<32x128xbf16>, vector<128x128xbf16>, vector<32x128xf32> -> vector<32x128xf32>
    %c0_3 = arith.constant 0 : index
    %c0_4 = arith.constant 0 : index
    %3 = vector.load %arg3[%c0_3, %c0_4] : memref<1x128xf32, #tpu.memory_space<vmem>>, vector<1x128xf32>
    %4 = vector.broadcast %3 : vector<1x128xf32> to vector<32x128xf32>
    %5 = arith.addf %2, %4 : vector<32x128xf32>
    %cst_5 = arith.constant 0.000000e+00 : f32
    %6 = vector.broadcast %cst_5 : f32 to vector<32x128xf32>
    %7 = arith.maximumf %5, %6 : vector<32x128xf32>
    %8 = arith.truncf %7 : vector<32x128xf32> to vector<32x128xbf16>
    %c0_6 = arith.constant 0 : index
    %c0_7 = arith.constant 0 : index
    %9 = vector.load %arg4[%c0_6, %c0_7] : memref<128x128xbf16, #tpu.memory_space<vmem>>, vector<128x128xbf16>
    %cst_8 = arith.constant dense<0.000000e+00> : vector<32x128xf32>
    %10 = tpu.matmul %8, %9, %cst_8 {dimension_numbers = #tpu.dot_dimension_numbers<[1], [0], [0], [1], [0, 0, 1, 1], [], []>} : vector<32x128xbf16>, vector<128x128xbf16>, vector<32x128xf32> -> vector<32x128xf32>
    %c0_9 = arith.constant 0 : index
    %c0_10 = arith.constant 0 : index
    %11 = vector.load %arg5[%c0_9, %c0_10] : memref<1x128xf32, #tpu.memory_space<vmem>>, vector<1x128xf32>
    %12 = vector.broadcast %11 : vector<1x128xf32> to vector<32x128xf32>
    %13 = arith.addf %10, %12 : vector<32x128xf32>
    %c0_11 = arith.constant 0 : index
    %c0_12 = arith.constant 0 : index
    %14 = vector.load %arg6[%c0_11, %c0_12] : memref<32x128xf32, #tpu.memory_space<vmem>>, vector<32x128xf32>
    tpu.vector_store %arg6[%c0_11, %c0_12], %13 {strides = array<i32>} : memref<32x128xf32, #tpu.memory_space<vmem>>, vector<32x128xf32>,
    return
  }
  func.func @transform_0(%arg0: i32) -> (i32, i32) {
    %c0_i32 = arith.constant 0 : i32
    %c0_i32_0 = arith.constant 0 : i32
    return %arg0, %c0_i32 : i32, i32
  }
  func.func @transform_1(%arg0: i32) -> (i32, i32) {
    %c0_i32 = arith.constant 0 : i32
    %c0_i32_0 = arith.constant 0 : i32
    %c0_i32_1 = arith.constant 0 : i32
    return %c0_i32, %c0_i32_0 : i32, i32
  }
  func.func @transform_2(%arg0: i32) -> (i32, i32) {
    %c0_i32 = arith.constant 0 : i32
    %c0_i32_0 = arith.constant 0 : i32
    %c0_i32_1 = arith.constant 0 : i32
    return %c0_i32, %c0_i32_0 : i32, i32
  }
  func.func @transform_3(%arg0: i32) -> (i32, i32) {
    %c0_i32 = arith.constant 0 : i32
    %c0_i32_0 = arith.constant 0 : i32
    %c0_i32_1 = arith.constant 0 : i32
    return %c0_i32, %c0_i32_0 : i32, i32
  }
  func.func @transform_4(%arg0: i32) -> (i32, i32) {
    %c0_i32 = arith.constant 0 : i32
    %c0_i32_0 = arith.constant 0 : i32
    %c0_i32_1 = arith.constant 0 : i32
    return %c0_i32, %c0_i32_0 : i32, i32
  }
  func.func @transform_5(%arg0: i32) -> (i32, i32) {
    %c0_i32 = arith.constant 0 : i32
    %c0_i32_0 = arith.constant 0 : i32
    return %arg0, %c0_i32 : i32, i32
  }
}

</mosaic_0001>

<bundles_post_ra>
// kernel: mlp_forward.1
= control target key start
LH: loop header
LB: loop body
LE: loop exit
PB: predicated region body
PF: predicated region fallthrough
CT: control target
= control target key end

     0   :  { %10 = vsyncpa [#allocation3], 0  ;;  %s553_s0 = inlined_call_operand.vmem [shape: bf16[32,128], index: 0, kind: input, shape index: {}]   ;;  %s554_s1 = inlined_call_operand.hbm [shape: bf16[128,128], index: 1, kind: input, shape index: {}]   ;;  %s555_s2 = inlined_call_operand.vmem [shape: f32[1,128], index: 2, kind: input, shape index: {}]   ;;  %s556_s3 = inlined_call_operand.hbm [shape: bf16[128,128], index: 3, kind: input, shape index: {}]   ;;  %s557_s4 = inlined_call_operand.vmem [shape: f32[1,128], index: 4, kind: input, shape index: {}]   ;;  %s558_s5 = inlined_call_operand.vmem [shape: f32[32,128], index: 5, kind: output, shape index: {}]  }
   0x1   :  { %11 = vsyncpa [#allocation5], 0  ;;  %s471_s18 = smov [#allocation2]   ;;  %s423_s22 = scalar_lea.hbm %s554_s1, 1024 }
   0x2   :  { %s19_s19 = sshll.u32 %s471_s18, 4  ;;  %p424_p0 = scmp.ne.s32.totalorder %s554_s1, %s423_s22  ;;  %s20_s19 = int_to_ptr.vmem [resolvable:$true] %s19_s19 }
   0x3   :  { %p427_p1 = scmp.lt.u32.totalorder %s423_s22, %s554_s1 }
   0x5   :  { %p429_p2 = pnand %p427_p1, %p424_p0 }
   0x7   :  { %432 = shalt.err (!%p429_p2)
}
   0x8   :  { %s433_s27 = scalar_lea.vmem %s20_s19, 1024  ;;  %p438_p4 = scmp.lt.s32.totalorder %s20_s19, %s20_s19 }
   0x9   :  { %p434_p3 = scmp.ne.s32.totalorder %s20_s19, %s433_s27  ;;  %p439_p5 = scmp.lt.s32.totalorder %s433_s27, %s433_s27 }
   0xb   :  { %p440_p6 = por %p439_p5, %p438_p4 }
   0xd   :  { %p441_p7 = pnand %p440_p6, %p434_p3 }
   0xf   :  { %444 = shalt.err (!%p441_p7)
}
  0x10   :  { %s472_s28 = smov 64   ;;  %s473_s29 = smov 4  }
  0x11   :  { %25 = dma.hbm_to_vmem [thread:$0]  %s554_s1, 1024, %s20_s19, [#allocation3], %s472_s28, %s472_s28, %s473_s29  }
  0x12   :  { %s474_s7 = smov [#allocation4]   ;;  %s445_s11 = scalar_lea.hbm %s556_s3, 1024 }
  0x13   :  { %s33_s8 = sshll.u32 %s474_s7, 4  ;;  %p446_p8 = scmp.ne.s32.totalorder %s556_s3, %s445_s11  ;;  %s34_s8 = int_to_ptr.vmem [resolvable:$true] %s33_s8 }
  0x14   :  { %p449_p9 = scmp.lt.u32.totalorder %s445_s11, %s556_s3 }
  0x16   :  { %p451_p10 = pnand %p449_p9, %p446_p8 }
  0x18   :  { %454 = shalt.err (!%p451_p10)
}
  0x19   :  { %s455_s16 = scalar_lea.vmem %s34_s8, 1024  ;;  %p460_p12 = scmp.lt.s32.totalorder %s34_s8, %s34_s8 }
  0x1a   :  { %p456_p11 = scmp.ne.s32.totalorder %s34_s8, %s455_s16  ;;  %p461_p13 = scmp.lt.s32.totalorder %s455_s16, %s455_s16 }
  0x1c   :  { %p462_p0 = por %p461_p13, %p460_p12 }
  0x1e   :  { %p463_p1 = pnand %p462_p0, %p456_p11 }
  0x20   :  { %466 = shalt.err (!%p463_p1)
}
  0x21   :  { %39 = dma.hbm_to_vmem [thread:$0]  %s556_s3, 1024, %s34_s8, [#allocation5], %s472_s28, %s472_s28, %s473_s29  }
  0x22   :  { %467 = dma.done.wait [#allocation3], 1024  }
  0x23   :  { %468 = vsyncadd [#allocation3], 4294966272 }
  0x24   :  { %469 = dma.done.wait [#allocation5], 1024  }
  0x25   :  { %470 = vsyncadd [#allocation5], 4294966272  ;;  %v405_v0 = vld [vmem:[#allocation2] sm:$0xff]   ;;  %v406_v1 = vld [vmem:[#allocation2 + $0x8] sm:$0xff]  }
  0x26   :  { %361 = vmatprep.subr.bf16.mxu0 %v405_v0  ;;  %v407_v2 = vld [vmem:[#allocation2 + $0x10] sm:$0xff]   ;;  %v408_v3 = vld [vmem:[#allocation2 + $0x18] sm:$0xff]   ;;  %v413_v4 = vld [vmem:[%s553_s0] sm:$0xff]  }
  0x27   :  { %362 = vmatpush3.bf16.msra.mxu0 %v405_v0  ;;  %377 = vmatprep.mubr.bf16.mxu0 %v413_v4  ;;  %v415_v5 = vld [vmem:[#allocation4] sm:$0xff]   ;;  %v416_v6 = vld [vmem:[#allocation4 + $0x8] sm:$0xff]   ;;  %v417_v8 = vld [vmem:[#allocation4 + $0x10] sm:$0xff]  }
  0x28   :  { %363 = vmatprep.subr.bf16.mxu0 %v406_v1  ;;  %v409_v7 = vld [vmem:[#allocation2 + $0x20] sm:$0xff]   ;;  %381 = vmatprep.subr.bf16.mxu1 %v415_v5  ;;  %v410_v9 = vld [vmem:[#allocation2 + $0x28] sm:$0xff]   ;;  %v418_v10 = vld [vmem:[#allocation4 + $0x18] sm:$0xff]  }
  0x29   :  { %382 = vmatpush3.bf16.msra.mxu1 %v415_v5  ;;  %v411_v11 = vld [vmem:[#allocation2 + $0x30] sm:$0xff]   ;;  %v419_v12 = vld [vmem:[#allocation4 + $0x20] sm:$0xff]   ;;  %v412_v13 = vld [vmem:[#allocation2 + $0x38] sm:$0xff]  }
  0x2a   :  { %383 = vmatprep.subr.bf16.mxu1 %v416_v6  ;;  %v420_v14 = vld [vmem:[#allocation4 + $0x28] sm:$0xff]   ;;  %v421_v16 = vld [vmem:[#allocation4 + $0x30] sm:$0xff]   ;;  %v422_v17 = vld [vmem:[#allocation4 + $0x38] sm:$0xff]  }
  0x2b   :  { %364 = vmatpush3.bf16.msra.mxu0 %v406_v1  ;;  %v414_v15 = vld [vmem:[%s553_s0 + $0x8] sm:$0xff]   ;;  %v321_v18 = vld [vmem:[%s555_s2] ss:$0 sm:$0xff] }
  0x2c   :  { %365 = vmatprep.subr.bf16.mxu0 %v407_v2  ;;  %v332_v33 = vld [vmem:[%s557_s4] ss:$0 sm:$0xff] }
  0x2d   :  { %384 = vmatpush3.bf16.msra.mxu1 %v416_v6 }
  0x2e   :  { %385 = vmatprep.subr.bf16.mxu1 %v417_v8 }
  0x2f   :  { %366 = vmatpush3.bf16.msra.mxu0 %v407_v2 }
  0x30   :  { %367 = vmatprep.subr.bf16.mxu0 %v408_v3 }
  0x31   :  { %386 = vmatpush3.bf16.msra.mxu1 %v417_v8 }
  0x32   :  { %387 = vmatprep.subr.bf16.mxu1 %v418_v10 }
  0x33   :  { %368 = vmatpush3.bf16.msra.mxu0 %v408_v3 }
  0x34   :  { %369 = vmatprep.subr.bf16.mxu0 %v409_v7 }
  0x35   :  { %388 = vmatpush3.bf16.msra.mxu1 %v418_v10 }
  0x36   :  { %389 = vmatprep.subr.bf16.mxu1 %v419_v12 }
  0x37   :  { %370 = vmatpush3.bf16.msra.mxu0 %v409_v7 }
  0x38   :  { %371 = vmatprep.subr.bf16.mxu0 %v410_v9 }
  0x39   :  { %390 = vmatpush3.bf16.msra.mxu1 %v419_v12 }
  0x3a   :  { %391 = vmatprep.subr.bf16.mxu1 %v420_v14 }
  0x3b   :  { %372 = vmatpush3.bf16.msra.mxu0 %v410_v9 }
  0x3c   :  { %373 = vmatprep.subr.bf16.mxu0 %v411_v11 }
  0x3d   :  { %392 = vmatpush3.bf16.msra.mxu1 %v420_v14 }
  0x3e   :  { %393 = vmatprep.subr.bf16.mxu1 %v421_v16 }
  0x3f   :  { %374 = vmatpush3.bf16.msra.mxu0 %v411_v11 }
  0x40   :  { %375 = vmatprep.subr.bf16.mxu0 %v412_v13 }
  0x41   :  { %394 = vmatpush3.bf16.msra.mxu1 %v421_v16 }
  0x42   :  { %395 = vmatprep.subr.bf16.mxu1 %v422_v17 }
  0x43   :  { %376 = vmatpush3.bf16.msra.mxu0 %v412_v13 }
  0x45   :  { %396 = vmatpush3.bf16.msra.mxu1 %v422_v17 }
  0x46   :  { %378 = vmatmul.mubr.bf16.vlgmr.msra.gmra.mrb[0].mxu0 %v414_v15 }
 0x119   :  { %v379_v19 = vpop.f32.mrb[0].mxu0 }
 0x11a   :  { %v179_v20 = vadd.f32 %v379_v19, %v321_v18  ;;  %v170_v21 = vpop.f32.mrb[1].mxu0 }
 0x11b   :  { %v171_v22 = vadd.f32 %v321_v18, %v170_v21  ;;  %v380_v23 = vpop.f32.mrb[2].mxu0 }
 0x11c   :  { %v182_v24 = vadd.f32 %v380_v23, %v321_v18  ;;  %v173_v25 = vpop.f32.mrb[3].mxu0  ;;  %v187_v27 = vmax.f32 %v179_v20, 0.0 }
 0x11d   :  { %v174_v26 = vadd.f32 %v321_v18, %v173_v25  ;;  %v185_v29 = vmax.f32 %v171_v22, 0.0 }
 0x11e   :  { %v188_v28 = vmax.f32 %v182_v24, 0.0 }
 0x11f   :  { %v186_v30 = vmax.f32 %v174_v26, 0.0 }
 0x120   :  { %v190_v31 = vpack.c.bf16 %v188_v28, %v187_v27 }
 0x121   :  { %v189_v32 = vpack.c.bf16 %v186_v30, %v185_v29 }
 0x123   :  { %397 = vmatprep.mubr.bf16.mxu1 %v189_v32 }
 0x124   :  { %398 = vmatmul.mubr.bf16.vlgmr.msra.gmra.mrb[0].mxu1 %v190_v31 }
 0x1f7   :  { %v399_v34 = vpop.f32.mrb[0].mxu1 }
 0x1f8   :  { %v305_v35 = vadd.f32 %v399_v34, %v332_v33  ;;  %v296_v36 = vpop.f32.mrb[1].mxu1 }
 0x1f9   :  { %v297_v37 = vadd.f32 %v332_v33, %v296_v36  ;;  %v400_v38 = vpop.f32.mrb[2].mxu1 }
 0x1fa   :  { %313 = vst [vmem:[%s558_s5 + $0x10] sm:$0xff] %v305_v35  ;;  %v308_v39 = vadd.f32 %v400_v38, %v332_v33  ;;  %v299_v40 = vpop.f32.mrb[3].mxu1 }
 0x1fb   :  { %311 = vst [vmem:[%s558_s5] sm:$0xff] %v297_v37  ;;  %v300_v41 = vadd.f32 %v332_v33, %v299_v40 }
 0x1fc   :  { %314 = vst [vmem:[%s558_s5 + $0x18] sm:$0xff] %v308_v39 }
 0x1fd   :  { %312 = vst [vmem:[%s558_s5 + $0x8] sm:$0xff] %v300_v41 }
 0x1fe   :  { %319 = vsyncpa [#allocation3], 1 }
 0x1ff   :  { %320 = vsyncpa [#allocation5], 1 }

</bundles_post_ra>
